<compile_context>
chip_gen: v6e
topology: v6e:2x2x1
jax: 0.10.0
libtpu: 0.0.40
codegen_flags: <defaults>
</compile_context>

<pallas_src>
import jax
import jax.numpy as jnp
from jax.experimental import pallas as pl
from jax.experimental.pallas import tpu as pltpu


def conv_relu_kernel(w_ref, p_ref, b_ref, o_ref):
    """Pure matmul + fused bias/ReLU epilogue.

    w_ref: [Cout, Kp]        weights, contraction ordered (cin, kh, kw), zero-padded
    p_ref: [Kp, NLp]         im2col patch matrix, lane dim = N*Ho*Wo (padded to 128x)
    b_ref: [Cout, 1]         bias (per-sublane broadcast)
    o_ref: [Cout, NLp]       lane-dense output
    """
    acc = jnp.dot(w_ref[...], p_ref[...], preferred_element_type=jnp.float32)
    acc = jnp.maximum(acc + b_ref[...].astype(jnp.float32), 0.0)
    o_ref[...] = acc.astype(o_ref.dtype)


def conv_relu(x_nchw, w_oihw, bias, *, stride=1, padding=1):
    """Equivalent of F.relu(nn.Conv2d(...)(x)) for NCHW input."""
    # TODO(synk): stride > 1 would need strided window extraction in the
    # wrapper's im2col; only stride=1 (the module default) is implemented.
    assert stride == 1, "only stride=1 (the module default) is implemented"

    N, Cin, H, W = x_nchw.shape
    Cout, _, KH, KW = w_oihw.shape
    Ho = H + 2 * padding - KH + 1
    Wo = W + 2 * padding - KW + 1

    # --- wrapper-side im2col (XLA), K ordered (cin, kh, kw) -----------------
    x = jnp.pad(x_nchw, ((0, 0), (0, 0), (padding, padding), (padding, padding)))
    rows = []
    for kh in range(KH):
        for kw in range(KW):
            rows.append(x[:, :, kh:kh + Ho, kw:kw + Wo])      # [N, Cin, Ho, Wo]
    p = jnp.stack(rows, axis=0)                               # [KH*KW, N, Cin, Ho, Wo]
    p = jnp.transpose(p, (2, 0, 1, 3, 4))                     # [Cin, KH*KW, N, Ho, Wo]

    K = Cin * KH * KW
    NL = N * Ho * Wo
    patches = p.reshape(K, NL)                                # lane dim = N*Ho*Wo

    # Weight matrix [Cout, K] with the same (cin, kh, kw) contraction order.
    w_mat = w_oihw.reshape(Cout, K)
    b2 = bias.reshape(Cout, 1)

    # --- sublane / lane alignment padding ----------------------------------
    Kp = ((K + 7) // 8) * 8                                   # 36 -> 40
    NLp = ((NL + 127) // 128) * 128                           # 512 -> 512
    if Kp != K:
        patches = jnp.pad(patches, ((0, Kp - K), (0, 0)))
        w_mat = jnp.pad(w_mat, ((0, 0), (0, Kp - K)))
    if NLp != NL:
        patches = jnp.pad(patches, ((0, 0), (0, NLp - NL)))

    # --- single-step pallas_call: one wide matmul for the whole batch ------
    out_flat = pl.pallas_call(
        conv_relu_kernel,
        out_shape=jax.ShapeDtypeStruct((Cout, NLp), x_nchw.dtype),
        grid_spec=pltpu.PrefetchScalarGridSpec(
            num_scalar_prefetch=0,
            grid=(1,),
            in_specs=[
                pl.BlockSpec((Cout, Kp), lambda i: (0, 0)),
                pl.BlockSpec((Kp, NLp), lambda i: (0, 0)),
                pl.BlockSpec((Cout, 1), lambda i: (0, 0)),
            ],
            out_specs=pl.BlockSpec((Cout, NLp), lambda i: (0, 0)),
        ),
        compiler_params=pltpu.CompilerParams(
            dimension_semantics=("arbitrary",)),
    )(w_mat, patches, b2)

    # [Cout, N*Ho*Wo] -> [N, Cout, Ho, Wo]  (tiny wrapper relayout).
    out = out_flat[:, :NL].reshape(Cout, N, Ho, Wo)
    return jnp.transpose(out, (1, 0, 2, 3))


if __name__ == "__main__":
    # Module config: Conv(in_planes=4, out_planes=8) -> k=3, s=1, p=1
    N, Cin, Cout, H, W, K = 2, 4, 8, 16, 16, 3

    key = jax.random.PRNGKey(0)
    kx, kw, kb = jax.random.split(key, 3)

    x = jax.random.normal(kx, (N, Cin, H, W), dtype=jnp.float32)
    # Deterministic parameter init (kaiming-uniform-like scale).
    fan_in = Cin * K * K
    bound = 1.0 / (fan_in ** 0.5)
    w = jax.random.uniform(kw, (Cout, Cin, K, K), jnp.float32, -bound, bound)
    b = jax.random.uniform(kb, (Cout,), jnp.float32, -bound, bound)

    out = jax.block_until_ready(conv_relu(x, w, b))

    # Reference check against XLA's conv.
    ref = jax.lax.conv_general_dilated(
        x, w, window_strides=(1, 1), padding=((1, 1), (1, 1)),
        dimension_numbers=("NCHW", "OIHW", "NCHW"))
    ref = jnp.maximum(ref + b[None, :, None, None], 0.0)

    assert out.shape == (N, Cout, H, W)
    assert jnp.allclose(out, ref, rtol=1e-5, atol=1e-5), "mismatch vs reference"
    print("KERNEL_OK")
</pallas_src>

<mosaic_0001>
module attributes {stable_mosaic.version = 11 : i64} {
  func.func @conv_relu_kernel(%arg0: i32, %arg1: memref<8x40xf32, #tpu.memory_space<vmem>>, %arg2: memref<40x512xf32, #tpu.memory_space<vmem>>, %arg3: memref<8x1xf32, #tpu.memory_space<vmem>>, %arg4: memref<8x512xf32, #tpu.memory_space<vmem>>) attributes {dimension_semantics = [#tpu.dimension_semantics<arbitrary>], iteration_bounds = array<i64: 1>, scalar_prefetch = 0 : i64, scratch_operands = 0 : i64, tpu.core_type = #tpu.core_type<tc>, window_params = [{pipeline_mode = #tpu.pipeline_mode<synchronous>, transform_indices = @transform_0, window_bounds = array<i64: 8, 40>}, {pipeline_mode = #tpu.pipeline_mode<synchronous>, transform_indices = @transform_1, window_bounds = array<i64: 40, 512>}, {pipeline_mode = #tpu.pipeline_mode<synchronous>, transform_indices = @transform_2, window_bounds = array<i64: 8, 1>}, {pipeline_mode = #tpu.pipeline_mode<synchronous>, transform_indices = @transform_3, window_bounds = array<i64: 8, 512>}]} {
    %c0 = arith.constant 0 : index
    %c0_0 = arith.constant 0 : index
    %0 = vector.load %arg1[%c0, %c0_0] : memref<8x40xf32, #tpu.memory_space<vmem>>, vector<8x40xf32>
    %c0_1 = arith.constant 0 : index
    %c0_2 = arith.constant 0 : index
    %1 = vector.load %arg2[%c0_1, %c0_2] : memref<40x512xf32, #tpu.memory_space<vmem>>, vector<40x512xf32>
    %cst = arith.constant dense<0.000000e+00> : vector<8x512xf32>
    %2 = tpu.matmul %0, %1, %cst {dimension_numbers = #tpu.dot_dimension_numbers<[1], [0], [0], [1], [0, 0, 1, 1], [], []>} : vector<8x40xf32>, vector<40x512xf32>, vector<8x512xf32> -> vector<8x512xf32>
    %c0_3 = arith.constant 0 : index
    %c0_4 = arith.constant 0 : index
    %3 = vector.load %arg3[%c0_3, %c0_4] : memref<8x1xf32, #tpu.memory_space<vmem>>, vector<8x1xf32>
    %4 = vector.broadcast %3 : vector<8x1xf32> to vector<8x512xf32>
    %5 = arith.addf %2, %4 : vector<8x512xf32>
    %cst_5 = arith.constant 0.000000e+00 : f32
    %6 = vector.broadcast %cst_5 : f32 to vector<8x512xf32>
    %7 = arith.maximumf %5, %6 : vector<8x512xf32>
    %c0_6 = arith.constant 0 : index
    %c0_7 = arith.constant 0 : index
    %8 = vector.load %arg4[%c0_6, %c0_7] : memref<8x512xf32, #tpu.memory_space<vmem>>, vector<8x512xf32>
    tpu.vector_store %arg4[%c0_6, %c0_7], %7 {strides = array<i32>} : memref<8x512xf32, #tpu.memory_space<vmem>>, vector<8x512xf32>,
    return
  }
  func.func @transform_0(%arg0: i32) -> (i32, i32) {
    %c0_i32 = arith.constant 0 : i32
    %c0_i32_0 = arith.constant 0 : i32
    %c0_i32_1 = arith.constant 0 : i32
    return %c0_i32, %c0_i32_0 : i32, i32
  }
  func.func @transform_1(%arg0: i32) -> (i32, i32) {
    %c0_i32 = arith.constant 0 : i32
    %c0_i32_0 = arith.constant 0 : i32
    %c0_i32_1 = arith.constant 0 : i32
    return %c0_i32, %c0_i32_0 : i32, i32
  }
  func.func @transform_2(%arg0: i32) -> (i32, i32) {
    %c0_i32 = arith.constant 0 : i32
    %c0_i32_0 = arith.constant 0 : i32
    %c0_i32_1 = arith.constant 0 : i32
    return %c0_i32, %c0_i32_0 : i32, i32
  }
  func.func @transform_3(%arg0: i32) -> (i32, i32) {
    %c0_i32 = arith.constant 0 : i32
    %c0_i32_0 = arith.constant 0 : i32
    %c0_i32_1 = arith.constant 0 : i32
    return %c0_i32, %c0_i32_0 : i32, i32
  }
}

</mosaic_0001>

<bundles_post_ra>
// kernel: tpu_custom_call.1
= control target key start
LH: loop header
LB: loop body
LE: loop exit
PB: predicated region body
PF: predicated region fallthrough
CT: control target
= control target key end

     0   :  { %8 = vsyncpa [#allocation3], 0  ;;  %s316_s0 = inlined_call_operand.vmem [shape: f32[8,40], index: 0, kind: input, shape index: {}]   ;;  %s317_s1 = inlined_call_operand.hbm [shape: f32[40,512], index: 1, kind: input, shape index: {}]   ;;  %s318_s2 = inlined_call_operand.vmem [shape: f32[8,1], index: 2, kind: input, shape index: {}]   ;;  %s319_s3 = inlined_call_operand.hbm [shape: f32[8,512], index: 3, kind: output, shape index: {}]  }
   0x1   :  { %9 = vsyncpa [#allocation4], 0  ;;  %s278_s12 = smov [#allocation2]  }
   0x2   :  { %s17_s13 = sshll.u32 %s278_s12, 4  ;;  %s18_s13 = int_to_ptr.vmem [resolvable:$true] %s17_s13 }
   0x3   :  { %s242_s14 = scalar_lea.vmem %s18_s13, 2560  ;;  %p247_p1 = scmp.lt.s32.totalorder %s18_s13, %s18_s13 }
   0x4   :  { %p243_p0 = scmp.ne.s32.totalorder %s18_s13, %s242_s14  ;;  %p248_p2 = scmp.lt.s32.totalorder %s242_s14, %s242_s14 }
   0x6   :  { %p249_p3 = por %p248_p2, %p247_p1 }
   0x8   :  { %p250_p4 = pnand %p249_p3, %p243_p0 }
   0xa   :  { %253 = shalt.err (!%p250_p4)
}
   0xb   :  { %s279_s15 = smov 512   ;;  %s280_s16 = smov 32  }
   0xc   :  { %23 = dma.hbm_to_vmem [thread:$0]  %s317_s1, 2560, %s18_s13, [#allocation3], %s279_s15, %s279_s15, %s280_s16  }
   0xd   :  { %274 = dma.done.wait [#allocation3], 2560  }
   0xe   :  { %275 = vsyncadd [#allocation3], 4294964736  ;;  %v281_v0 = vmov 0.0   ;;  %v282_v1 = vmov 0   ;;  %v47_v2 = vld [vmem:[#allocation2 + $0x88] sm:$0xff]  ;;  %v49_v3 = vld [vmem:[#allocation2 + $0x98] sm:$0xff] }
   0xf   :  { %124 = vmatprep.mubr.f32.mxu0 %v281_v0  ;;  %195 = vmatprep.mubr.f32.mxu1 %v281_v0  ;;  %v46_v4 = vld [vmem:[#allocation2 + $0x80] sm:$0xff]  ;;  %v48_v5 = vld [vmem:[#allocation2 + $0x90] sm:$0xff]  ;;  %v43_v6 = vld [vmem:[#allocation2 + $0x68] sm:$0xff]  ;;  %vm56_vm0 = vcmask 326656  }
  0x10   :  { %233 = vset.pattern.permute.xlu0 %v282_v1  ;;  %82 = vmatprep.subr.mxu0 %v47_v2  ;;  %v45_v7 = vld [vmem:[#allocation2 + $0x78] sm:$0xff]  ;;  %v42_v8 = vld [vmem:[#allocation2 + $0x60] sm:$0xff]  ;;  %v44_v9 = vld [vmem:[#allocation2 + $0x70] sm:$0xff] }
  0x11   :  { %153 = vmatprep.subr.mxu1 %v49_v3  ;;  %83 = vmatpush1.msra.mxu0 %v46_v4  ;;  %v39_v10 = vld [vmem:[#allocation2 + $0x48] sm:$0xff]  ;;  %v41_v11 = vld [vmem:[#allocation2 + $0x58] sm:$0xff]  ;;  %v38_v12 = vld [vmem:[#allocation2 + $0x40] sm:$0xff] }
  0x12   :  { %154 = vmatpush1.msra.mxu1 %v48_v5  ;;  %84 = vmatprep.subr.mxu0 %v43_v6  ;;  %v40_v13 = vld [vmem:[#allocation2 + $0x50] sm:$0xff]  ;;  %v35_v14 = vld [vmem:[#allocation2 + $0x28] sm:$0xff]  ;;  %v37_v15 = vld [vmem:[#allocation2 + $0x38] sm:$0xff] }
  0x13   :  { %155 = vmatprep.subr.mxu1 %v45_v7  ;;  %85 = vmatpush1.msra.mxu0 %v42_v8  ;;  %v34_v16 = vld [vmem:[#allocation2 + $0x20] sm:$0xff]  ;;  %v36_v17 = vld [vmem:[#allocation2 + $0x30] sm:$0xff]  ;;  %v31_v18 = vld [vmem:[#allocation2 + $0x8] sm:$0xff] }
  0x14   :  { %156 = vmatpush1.msra.mxu1 %v44_v9  ;;  %86 = vmatprep.subr.mxu0 %v39_v10  ;;  %v33_v19 = vld [vmem:[#allocation2 + $0x18] sm:$0xff]  ;;  %v30_v20 = vld [vmem:[#allocation2] sm:$0xff]  ;;  %v32_v21 = vld [vmem:[#allocation2 + $0x10] sm:$0xff] }
  0x15   :  { %157 = vmatprep.subr.mxu1 %v41_v11  ;;  %87 = vmatpush1.msra.mxu0 %v38_v12  ;;  %v29_v22 = vld [vmem:[%s316_s0] sm:$0xff]  ;;  %s283_s0 = smov [#allocation5]  }
  0x16   :  { %158 = vmatpush1.msra.mxu1 %v40_v13  ;;  %88 = vmatprep.subr.mxu0 %v35_v14  ;;  %v50_v23 = vld [vmem:[%s318_s2] sm:$0xff]  ;;  %s216_s22 = sshll.u32 %s283_s0, 4  ;;  %s217_s22 = int_to_ptr.vmem [resolvable:$true] %s216_s22 }
  0x17   :  { %159 = vmatprep.subr.mxu1 %v37_v15  ;;  %89 = vmatpush1.msra.mxu0 %v34_v16  ;;  %s254_s2 = scalar_lea.vmem %s217_s22, 512  ;;  %p259_p6 = scmp.lt.s32.totalorder %s217_s22, %s217_s22 }
  0x18   :  { %160 = vmatpush1.msra.mxu1 %v36_v17  ;;  %90 = vmatprep.subr.mxu0 %v31_v18  ;;  %p255_p5 = scmp.ne.s32.totalorder %s217_s22, %s254_s2  ;;  %p260_p7 = scmp.lt.s32.totalorder %s254_s2, %s254_s2 }
  0x19   :  { %161 = vmatprep.subr.mxu1 %v33_v19  ;;  %91 = vmatpush1.msra.mxu0 %v30_v20 }
  0x1a   :  { %162 = vmatpush1.msra.mxu1 %v32_v21  ;;  %225 = vmatmul.mubr.msk.f32.vlgmr.msra.gmra.mxu0 %vm56_vm0, %v29_v22  ;;  %p261_p8 = por %p260_p7, %p259_p6 }
  0x1b   :  { %226 = vmatmul.mubr.msk.f32.vlgmr.msra.gmra.mxu1 %vm56_vm0, %v29_v22  ;;  %53 = vperm.xlu0 %233, %v50_v23  }
  0x1c   :  { %p262_p9 = pnand %p261_p8, %p255_p5 }
  0x96   :  { %v54_v24 = vpop.permute.xlu0 %53 }
  0xda   :  { %v126_v25 = vpop.f32.mrf.mxu0 }
  0xdb   :  { %v197_v26 = vpop.f32.mrf.mxu1  ;;  %v127_v27 = vadd.f32 %v126_v25, %v54_v24 }
  0xdc   :  { %v198_v28 = vadd.f32 %v197_v26, %v54_v24  ;;  %v128_v29 = vpop.f32.mrf.mxu0 }
  0xdd   :  { %v199_v30 = vpop.f32.mrf.mxu1  ;;  %v202_v31 = vmax.f32 %v127_v27, 0.0  ;;  %v129_v33 = vadd.f32 %v128_v29, %v54_v24 }
  0xde   :  { %v204_v32 = vmax.f32 %v198_v28, 0.0  ;;  %v200_v34 = vadd.f32 %v199_v30, %v54_v24 }
  0xdf   :  { %206 = vst [vmem:[#allocation5] sm:$0xff] %v202_v31  ;;  %v203_v35 = vmax.f32 %v129_v33, 0.0 }
  0xe0   :  { %208 = vst [vmem:[#allocation5 + $0x10] sm:$0xff] %v204_v32  ;;  %v205_v36 = vmax.f32 %v200_v34, 0.0 }
  0xe1   :  { %207 = vst [vmem:[#allocation5 + $0x8] sm:$0xff] %v203_v35 }
  0xe2   :  { %209 = vst [vmem:[#allocation5 + $0x18] sm:$0xff] %v205_v36 }
  0xe3   :  { %265 = shalt.err (!%p262_p9)
}
  0xe4   :  { %219 = dma.vmem_to_hbm [thread:$0]  %s217_s22, 512, %s319_s3, [#allocation4]  }
  0xe5   :  { %276 = dma.done.wait [#allocation4], 512  }
  0xe6   :  { %277 = vsyncadd [#allocation4], 4294966784 }
  0xe7   :  { %223 = vsyncpa [#allocation3], 1 }
  0xe8   :  { %224 = vsyncpa [#allocation4], 1 }

</bundles_post_ra>
